<compile_context>
chip_gen: v7x
topology: tpu7x:2x2x1
jax: 0.10.0
libtpu: 0.0.40
codegen_flags: <defaults>
</compile_context>

<pallas_src>
import functools

import jax
import jax.numpy as jnp
from jax.experimental import pallas as pl
from jax.experimental.pallas import tpu as pltpu

HIDDEN_LAYER = 256


def _qnet_kernel(obs_ref, act_ref,
                 w1o_ref, w1a_ref, b1_ref,
                 w2_ref, b2_ref,
                 w3_ref, b3_ref,
                 o_ref):
    """One batch tile: fused concat + both critics (3 layers each)."""
    obs = obs_ref[...]                                   # (TB, Do) bf16
    act = act_ref[...]                                   # (TB, Da) bf16
    H = w2_ref.shape[-1]

    # Fused layer 1 for both critics: x @ W1 == obs @ W1o + act @ W1a
    h = (jnp.dot(obs, w1o_ref[...], preferred_element_type=jnp.float32)
         + jnp.dot(act, w1a_ref[...], preferred_element_type=jnp.float32)
         + b1_ref[...])                                  # (TB, 2H) f32
    h = jnp.maximum(h, 0.0)                              # ReLU (f32)
    h_bf = h.astype(jnp.bfloat16)                        # bf16 for MXU layer 2

    qs = []
    for i in range(2):                                   # unrolled critics
        hi = h_bf[:, i * H:(i + 1) * H]                  # (TB, H) static slice
        h2 = (jnp.dot(hi, w2_ref[i], preferred_element_type=jnp.float32)
              + b2_ref[i])                               # (TB, H) f32
        h2 = jnp.maximum(h2, 0.0)                        # ReLU
        # Layer 3 as VPU multiply + XLU lane reduction (avoid N=1 MXU matmul).
        qs.append(jnp.sum(h2 * w3_ref[i], axis=-1, keepdims=True))  # (TB, 1)

    # Single lane-dense store: pack both critics + final bias into (TB, 2).
    q = jnp.concatenate(qs, axis=-1) + b3_ref[...]       # (TB, 2) f32
    o_ref[...] = q.astype(o_ref.dtype)


def _round_up(x, m):
    return (x + m - 1) // m * m


@functools.partial(jax.jit, static_argnames=("tb_max",))
def qnetwork_forward(obs, act, params, *, tb_max=256):
    """obs: (B, dim_obs), act: (B, dim_act) -> (q1, q2), each (B, 1) f32."""
    B, Do = obs.shape
    Da = act.shape[1]
    H = params["w2"].shape[-1]

    # Row tile: multiple of 8 (f32 sublane), capped at tb_max (VMEM-safe on
    # all of v5e/v6e/v7x), padded batch so the grid divides evenly.
    TB = min(tb_max, _round_up(B, 8))
    B_pad = _round_up(B, TB)

    obs_p = jnp.zeros((B_pad, Do), jnp.bfloat16).at[:B].set(
        obs.astype(jnp.bfloat16))
    act_p = jnp.zeros((B_pad, Da), jnp.bfloat16).at[:B].set(
        act.astype(jnp.bfloat16))

    out = pl.pallas_call(
        _qnet_kernel,
        out_shape=jax.ShapeDtypeStruct((B_pad, 2), jnp.float32),
        grid=(B_pad // TB,),
        in_specs=[
            pl.BlockSpec((TB, Do), lambda i: (i, 0)),        # obs tile
            pl.BlockSpec((TB, Da), lambda i: (i, 0)),        # act tile
            pl.BlockSpec((Do, 2 * H), lambda i: (0, 0)),     # w1_obs (resident)
            pl.BlockSpec((Da, 2 * H), lambda i: (0, 0)),     # w1_act (resident)
            pl.BlockSpec((1, 2 * H), lambda i: (0, 0)),      # b1
            pl.BlockSpec((2, H, H), lambda i: (0, 0, 0)),    # w2
            pl.BlockSpec((2, 1, H), lambda i: (0, 0, 0)),    # b2
            pl.BlockSpec((2, 1, H), lambda i: (0, 0, 0)),    # w3 (row layout)
            pl.BlockSpec((1, 2), lambda i: (0, 0)),          # b3
        ],
        out_specs=pl.BlockSpec((TB, 2), lambda i: (i, 0)),
        compiler_params=pltpu.CompilerParams(
            dimension_semantics=("parallel",)),
    )(obs_p, act_p,
      params["w1_obs"], params["w1_act"], params["b1"],
      params["w2"], params["b2"], params["w3"], params["b3"])

    return out[:B, 0:1], out[:B, 1:2]


def _xavier_uniform(key, shape):
    # matches torch.nn.init.xavier_uniform_ (gain=1) for a Linear weight
    fan_in, fan_out = shape[0], shape[1]
    bound = jnp.sqrt(6.0 / (fan_in + fan_out))
    return jax.random.uniform(key, shape, jnp.float32, -bound, bound)


def init_qnetwork_params(key, dim_obs, dim_act, hidden=HIDDEN_LAYER):
    """Params in the kernel's packed layout. Matmul weights stored in bf16."""
    din = dim_obs + dim_act
    keys = jax.random.split(key, 6)

    # Per-critic layer-1 weights (Din, H): split rows (obs/act) and concat
    # both critics along the output axis -> fused (., 2H) weights.
    w1_c = [_xavier_uniform(keys[0], (din, hidden)),
            _xavier_uniform(keys[1], (din, hidden))]
    w1_obs = jnp.concatenate([w1_c[0][:dim_obs], w1_c[1][:dim_obs]], axis=1)
    w1_act = jnp.concatenate([w1_c[0][dim_obs:], w1_c[1][dim_obs:]], axis=1)
    b1 = jnp.zeros((1, 2 * hidden), jnp.float32)

    w2 = jnp.stack([_xavier_uniform(keys[2], (hidden, hidden)),
                    _xavier_uniform(keys[3], (hidden, hidden))])      # (2,H,H)
    b2 = jnp.zeros((2, 1, hidden), jnp.float32)

    # Layer-3 weight (H, 1) stored as a row (1, H) for the VPU reduction.
    w3 = jnp.stack([_xavier_uniform(keys[4], (hidden, 1)).T,
                    _xavier_uniform(keys[5], (hidden, 1)).T])         # (2,1,H)
    b3 = jnp.zeros((1, 2), jnp.float32)

    return {"w1_obs": w1_obs.astype(jnp.bfloat16),
            "w1_act": w1_act.astype(jnp.bfloat16),
            "b1": b1,
            "w2": w2.astype(jnp.bfloat16),
            "b2": b2,
            "w3": w3,            # f32: used on the VPU path, tiny
            "b3": b3}


def _reference_forward(obs, act, params):
    """Plain-JAX reference: concat + 3 Linear/ReLU per critic (same dtypes)."""
    x = jnp.concatenate([obs, act], axis=-1).astype(jnp.bfloat16)
    H = params["w2"].shape[-1]
    outs = []
    for i in range(2):
        w1 = jnp.concatenate([params["w1_obs"][:, i * H:(i + 1) * H],
                              params["w1_act"][:, i * H:(i + 1) * H]], axis=0)
        b1 = params["b1"][:, i * H:(i + 1) * H]
        h = jnp.maximum(
            jnp.dot(x, w1, preferred_element_type=jnp.float32) + b1, 0.0)
        h = h.astype(jnp.bfloat16)
        h2 = jnp.maximum(
            jnp.dot(h, params["w2"][i],
                    preferred_element_type=jnp.float32) + params["b2"][i], 0.0)
        q = (jnp.sum(h2 * params["w3"][i], axis=-1, keepdims=True)
             + params["b3"][:, i:i + 1])
        outs.append(q)
    return outs[0], outs[1]


if __name__ == "__main__":
    key = jax.random.PRNGKey(0)
    k_param, k_obs, k_act = jax.random.split(key, 3)

    dim_obs, dim_act, batch = 16, 4, 8
    params = init_qnetwork_params(k_param, dim_obs, dim_act)

    obs = jax.random.normal(k_obs, (batch, dim_obs), jnp.float32)
    act = jax.random.normal(k_act, (batch, dim_act), jnp.float32)

    q1, q2 = qnetwork_forward(obs, act, params)
    jax.block_until_ready((q1, q2))

    r1, r2 = _reference_forward(obs, act, params)
    assert q1.shape == (batch, 1) and q2.shape == (batch, 1)
    assert jnp.allclose(q1, r1, atol=1e-2, rtol=1e-2)
    assert jnp.allclose(q2, r2, atol=1e-2, rtol=1e-2)

    print("KERNEL_OK")
</pallas_src>

<mosaic_0001>
module attributes {stable_mosaic.version = 11 : i64} {
  func.func @_qnet_kernel(%arg0: i32, %arg1: memref<8x16xbf16, #tpu.memory_space<vmem>>, %arg2: memref<8x4xbf16, #tpu.memory_space<vmem>>, %arg3: memref<16x512xbf16, #tpu.memory_space<vmem>>, %arg4: memref<4x512xbf16, #tpu.memory_space<vmem>>, %arg5: memref<1x512xf32, #tpu.memory_space<vmem>>, %arg6: memref<2x256x256xbf16, #tpu.memory_space<vmem>>, %arg7: memref<2x1x256xf32, #tpu.memory_space<vmem>>, %arg8: memref<2x1x256xf32, #tpu.memory_space<vmem>>, %arg9: memref<1x2xf32, #tpu.memory_space<vmem>>, %arg10: memref<8x2xf32, #tpu.memory_space<vmem>>) attributes {dimension_semantics = [#tpu.dimension_semantics<parallel>], iteration_bounds = array<i64: 1>, scalar_prefetch = 0 : i64, scratch_operands = 0 : i64, tpu.core_type = #tpu.core_type<tc>, window_params = [{transform_indices = @transform_0, window_bounds = array<i64: 8, 16>}, {transform_indices = @transform_1, window_bounds = array<i64: 8, 4>}, {pipeline_mode = #tpu.pipeline_mode<synchronous>, transform_indices = @transform_2, window_bounds = array<i64: 16, 512>}, {pipeline_mode = #tpu.pipeline_mode<synchronous>, transform_indices = @transform_3, window_bounds = array<i64: 4, 512>}, {pipeline_mode = #tpu.pipeline_mode<synchronous>, transform_indices = @transform_4, window_bounds = array<i64: 1, 512>}, {pipeline_mode = #tpu.pipeline_mode<synchronous>, transform_indices = @transform_5, window_bounds = array<i64: 2, 256, 256>}, {pipeline_mode = #tpu.pipeline_mode<synchronous>, transform_indices = @transform_6, window_bounds = array<i64: 2, 1, 256>}, {pipeline_mode = #tpu.pipeline_mode<synchronous>, transform_indices = @transform_7, window_bounds = array<i64: 2, 1, 256>}, {pipeline_mode = #tpu.pipeline_mode<synchronous>, transform_indices = @transform_8, window_bounds = array<i64: 1, 2>}, {transform_indices = @transform_9, window_bounds = array<i64: 8, 2>}]} {
    %c0 = arith.constant 0 : index
    %c0_0 = arith.constant 0 : index
    %0 = vector.load %arg1[%c0, %c0_0] : memref<8x16xbf16, #tpu.memory_space<vmem>>, vector<8x16xbf16>
    %c0_1 = arith.constant 0 : index
    %c0_2 = arith.constant 0 : index
    %1 = vector.load %arg2[%c0_1, %c0_2] : memref<8x4xbf16, #tpu.memory_space<vmem>>, vector<8x4xbf16>
    %c0_3 = arith.constant 0 : index
    %c0_4 = arith.constant 0 : index
    %2 = vector.load %arg3[%c0_3, %c0_4] : memref<16x512xbf16, #tpu.memory_space<vmem>>, vector<16x512xbf16>
    %cst = arith.constant dense<0.000000e+00> : vector<8x512xf32>
    %3 = tpu.matmul %0, %2, %cst {dimension_numbers = #tpu.dot_dimension_numbers<[1], [0], [0], [1], [0, 0, 1, 1], [], []>} : vector<8x16xbf16>, vector<16x512xbf16>, vector<8x512xf32> -> vector<8x512xf32>
    %c0_5 = arith.constant 0 : index
    %c0_6 = arith.constant 0 : index
    %4 = vector.load %arg4[%c0_5, %c0_6] : memref<4x512xbf16, #tpu.memory_space<vmem>>, vector<4x512xbf16>
    %cst_7 = arith.constant dense<0.000000e+00> : vector<8x512xf32>
    %5 = tpu.matmul %1, %4, %cst_7 {dimension_numbers = #tpu.dot_dimension_numbers<[1], [0], [0], [1], [0, 0, 1, 1], [], []>} : vector<8x4xbf16>, vector<4x512xbf16>, vector<8x512xf32> -> vector<8x512xf32>
    %6 = arith.addf %3, %5 : vector<8x512xf32>
    %c0_8 = arith.constant 0 : index
    %c0_9 = arith.constant 0 : index
    %7 = vector.load %arg5[%c0_8, %c0_9] : memref<1x512xf32, #tpu.memory_space<vmem>>, vector<1x512xf32>
    %8 = vector.broadcast %7 : vector<1x512xf32> to vector<8x512xf32>
    %9 = arith.addf %6, %8 : vector<8x512xf32>
    %cst_10 = arith.constant 0.000000e+00 : f32
    %10 = vector.broadcast %cst_10 : f32 to vector<8x512xf32>
    %11 = arith.maximumf %9, %10 : vector<8x512xf32>
    %12 = arith.truncf %11 : vector<8x512xf32> to vector<8x512xbf16>
    %13 = vector.extract_strided_slice %12 {offsets = [0, 0], sizes = [8, 256], strides = [1, 1]} : vector<8x512xbf16> to vector<8x256xbf16>
    %c0_11 = arith.constant 0 : index
    %c0_12 = arith.constant 0 : index
    %c0_13 = arith.constant 0 : index
    %14 = vector.load %arg6[%c0_11, %c0_12, %c0_13] : memref<2x256x256xbf16, #tpu.memory_space<vmem>>, vector<1x256x256xbf16>
    %15 = vector.shape_cast %14 : vector<1x256x256xbf16> to vector<256x256xbf16>
    %cst_14 = arith.constant dense<0.000000e+00> : vector<8x256xf32>
    %16 = tpu.matmul %13, %15, %cst_14 {dimension_numbers = #tpu.dot_dimension_numbers<[1], [0], [0], [1], [0, 0, 1, 1], [], []>} : vector<8x256xbf16>, vector<256x256xbf16>, vector<8x256xf32> -> vector<8x256xf32>
    %c0_15 = arith.constant 0 : index
    %c0_16 = arith.constant 0 : index
    %c0_17 = arith.constant 0 : index
    %17 = vector.load %arg7[%c0_15, %c0_16, %c0_17] : memref<2x1x256xf32, #tpu.memory_space<vmem>>, vector<1x1x256xf32>
    %18 = vector.shape_cast %17 : vector<1x1x256xf32> to vector<1x256xf32>
    %19 = vector.broadcast %18 : vector<1x256xf32> to vector<8x256xf32>
    %20 = arith.addf %16, %19 : vector<8x256xf32>
    %cst_18 = arith.constant 0.000000e+00 : f32
    %21 = vector.broadcast %cst_18 : f32 to vector<8x256xf32>
    %22 = arith.maximumf %20, %21 : vector<8x256xf32>
    %c0_19 = arith.constant 0 : index
    %c0_20 = arith.constant 0 : index
    %c0_21 = arith.constant 0 : index
    %23 = vector.load %arg8[%c0_19, %c0_20, %c0_21] : memref<2x1x256xf32, #tpu.memory_space<vmem>>, vector<1x1x256xf32>
    %24 = vector.shape_cast %23 : vector<1x1x256xf32> to vector<1x256xf32>
    %25 = vector.broadcast %24 : vector<1x256xf32> to vector<8x256xf32>
    %26 = arith.mulf %22, %25 : vector<8x256xf32>
    %cst_22 = arith.constant dense<0.000000e+00> : vector<8xf32>
    %27 = vector.multi_reduction <add>, %26, %cst_22 [1] : vector<8x256xf32> to vector<8xf32>
    %28 = vector.shape_cast %27 : vector<8xf32> to vector<8x1xf32>
    %29 = vector.extract_strided_slice %12 {offsets = [0, 256], sizes = [8, 256], strides = [1, 1]} : vector<8x512xbf16> to vector<8x256xbf16>
    %c1 = arith.constant 1 : index
    %c0_23 = arith.constant 0 : index
    %c0_24 = arith.constant 0 : index
    %30 = vector.load %arg6[%c1, %c0_23, %c0_24] : memref<2x256x256xbf16, #tpu.memory_space<vmem>>, vector<1x256x256xbf16>
    %31 = vector.shape_cast %30 : vector<1x256x256xbf16> to vector<256x256xbf16>
    %cst_25 = arith.constant dense<0.000000e+00> : vector<8x256xf32>
    %32 = tpu.matmul %29, %31, %cst_25 {dimension_numbers = #tpu.dot_dimension_numbers<[1], [0], [0], [1], [0, 0, 1, 1], [], []>} : vector<8x256xbf16>, vector<256x256xbf16>, vector<8x256xf32> -> vector<8x256xf32>
    %c1_26 = arith.constant 1 : index
    %c0_27 = arith.constant 0 : index
    %c0_28 = arith.constant 0 : index
    %33 = vector.load %arg7[%c1_26, %c0_27, %c0_28] : memref<2x1x256xf32, #tpu.memory_space<vmem>>, vector<1x1x256xf32>
    %34 = vector.shape_cast %33 : vector<1x1x256xf32> to vector<1x256xf32>
    %35 = vector.broadcast %34 : vector<1x256xf32> to vector<8x256xf32>
    %36 = arith.addf %32, %35 : vector<8x256xf32>
    %cst_29 = arith.constant 0.000000e+00 : f32
    %37 = vector.broadcast %cst_29 : f32 to vector<8x256xf32>
    %38 = arith.maximumf %36, %37 : vector<8x256xf32>
    %c1_30 = arith.constant 1 : index
    %c0_31 = arith.constant 0 : index
    %c0_32 = arith.constant 0 : index
    %39 = vector.load %arg8[%c1_30, %c0_31, %c0_32] : memref<2x1x256xf32, #tpu.memory_space<vmem>>, vector<1x1x256xf32>
    %40 = vector.shape_cast %39 : vector<1x1x256xf32> to vector<1x256xf32>
    %41 = vector.broadcast %40 : vector<1x256xf32> to vector<8x256xf32>
    %42 = arith.mulf %38, %41 : vector<8x256xf32>
    %cst_33 = arith.constant dense<0.000000e+00> : vector<8xf32>
    %43 = vector.multi_reduction <add>, %42, %cst_33 [1] : vector<8x256xf32> to vector<8xf32>
    %44 = vector.shape_cast %43 : vector<8xf32> to vector<8x1xf32>
    %45 = tpu.concatenate %28, %44 in 1 : vector<8x1xf32>, vector<8x1xf32> -> vector<8x2xf32>
    %c0_34 = arith.constant 0 : index
    %c0_35 = arith.constant 0 : index
    %46 = vector.load %arg9[%c0_34, %c0_35] : memref<1x2xf32, #tpu.memory_space<vmem>>, vector<1x2xf32>
    %47 = vector.broadcast %46 : vector<1x2xf32> to vector<8x2xf32>
    %48 = arith.addf %45, %47 : vector<8x2xf32>
    %c0_36 = arith.constant 0 : index
    %c0_37 = arith.constant 0 : index
    %49 = vector.load %arg10[%c0_36, %c0_37] : memref<8x2xf32, #tpu.memory_space<vmem>>, vector<8x2xf32>
    tpu.vector_store %arg10[%c0_36, %c0_37], %48 {strides = array<i32>} : memref<8x2xf32, #tpu.memory_space<vmem>>, vector<8x2xf32>,
    return
  }
  func.func @transform_0(%arg0: i32) -> (i32, i32) {
    %c0_i32 = arith.constant 0 : i32
    %c0_i32_0 = arith.constant 0 : i32
    return %arg0, %c0_i32 : i32, i32
  }
  func.func @transform_1(%arg0: i32) -> (i32, i32) {
    %c0_i32 = arith.constant 0 : i32
    %c0_i32_0 = arith.constant 0 : i32
    return %arg0, %c0_i32 : i32, i32
  }
  func.func @transform_2(%arg0: i32) -> (i32, i32) {
    %c0_i32 = arith.constant 0 : i32
    %c0_i32_0 = arith.constant 0 : i32
    %c0_i32_1 = arith.constant 0 : i32
    return %c0_i32, %c0_i32_0 : i32, i32
  }
  func.func @transform_3(%arg0: i32) -> (i32, i32) {
    %c0_i32 = arith.constant 0 : i32
    %c0_i32_0 = arith.constant 0 : i32
    %c0_i32_1 = arith.constant 0 : i32
    return %c0_i32, %c0_i32_0 : i32, i32
  }
  func.func @transform_4(%arg0: i32) -> (i32, i32) {
    %c0_i32 = arith.constant 0 : i32
    %c0_i32_0 = arith.constant 0 : i32
    %c0_i32_1 = arith.constant 0 : i32
    return %c0_i32, %c0_i32_0 : i32, i32
  }
  func.func @transform_5(%arg0: i32) -> (i32, i32, i32) {
    %c0_i32 = arith.constant 0 : i32
    %c0_i32_0 = arith.constant 0 : i32
    %c0_i32_1 = arith.constant 0 : i32
    %c0_i32_2 = arith.constant 0 : i32
    return %c0_i32, %c0_i32_0, %c0_i32_1 : i32, i32, i32
  }
  func.func @transform_6(%arg0: i32) -> (i32, i32, i32) {
    %c0_i32 = arith.constant 0 : i32
    %c0_i32_0 = arith.constant 0 : i32
    %c0_i32_1 = arith.constant 0 : i32
    %c0_i32_2 = arith.constant 0 : i32
    return %c0_i32, %c0_i32_0, %c0_i32_1 : i32, i32, i32
  }
  func.func @transform_7(%arg0: i32) -> (i32, i32, i32) {
    %c0_i32 = arith.constant 0 : i32
    %c0_i32_0 = arith.constant 0 : i32
    %c0_i32_1 = arith.constant 0 : i32
    %c0_i32_2 = arith.constant 0 : i32
    return %c0_i32, %c0_i32_0, %c0_i32_1 : i32, i32, i32
  }
  func.func @transform_8(%arg0: i32) -> (i32, i32) {
    %c0_i32 = arith.constant 0 : i32
    %c0_i32_0 = arith.constant 0 : i32
    %c0_i32_1 = arith.constant 0 : i32
    return %c0_i32, %c0_i32_0 : i32, i32
  }
  func.func @transform_9(%arg0: i32) -> (i32, i32) {
    %c0_i32 = arith.constant 0 : i32
    %c0_i32_0 = arith.constant 0 : i32
    return %arg0, %c0_i32 : i32, i32
  }
}

</mosaic_0001>

<bundles_post_ra>
// kernel: qnetwork_forward.1
= control target key start
LH: loop header
LB: loop body
LE: loop exit
PB: predicated region body
PF: predicated region fallthrough
CT: control target
= control target key end

     0   :  { %14 = vsyncpa [#allocation3], 0  ;;  %s1248_s0 = inlined_call_operand.vmem [shape: bf16[8,16], index: 0, kind: input, shape index: {}]   ;;  %s1249_s1 = inlined_call_operand.vmem [shape: bf16[8,4], index: 1, kind: input, shape index: {}]   ;;  %s1250_s2 = inlined_call_operand.vmem [shape: bf16[16,512], index: 2, kind: input, shape index: {}]   ;;  %s1251_s3 = inlined_call_operand.vmem [shape: bf16[4,512], index: 3, kind: input, shape index: {}]   ;;  %s1252_s4 = inlined_call_operand.vmem [shape: f32[1,512], index: 4, kind: input, shape index: {}]   ;;  %s1253_s5 = inlined_call_operand.hbm [shape: bf16[2,256,256], index: 5, kind: input, shape index: {}]   ;;  %s1254_s6 = inlined_call_operand.hbm [shape: f32[2,1,256], index: 6, kind: input, shape index: {}]   ;;  %s1255_s7 = inlined_call_operand.vmem [shape: f32[2,1,256], index: 7, kind: input, shape index: {}]   ;;  %s1256_s8 = inlined_call_operand.vmem [shape: f32[1,2], index: 8, kind: input, shape index: {}]   ;;  %s1257_s9 = inlined_call_operand.vmem [shape: f32[8,2], index: 9, kind: output, shape index: {}]  }
   0x1   :  { %15 = vsyncpa [#allocation5], 0  ;;  %s1109_s30 = smov [#allocation2]   ;;  %s1061_s13 = scalar_lea.hbm %s1253_s5, 8192 }
   0x2   :  { %s31_s10 = sshll.u32 %s1109_s30, 4  ;;  %p1062_p0 = scmp.ne.s32.totalorder %s1253_s5, %s1061_s13  ;;  %s32_s10 = int_to_ptr.vmem [resolvable:$true] %s31_s10 }
   0x3   :  { %p1065_p1 = scmp.lt.u32.totalorder %s1061_s13, %s1253_s5 }
   0x5   :  { %p1067_p2 = pnand %p1065_p1, %p1062_p0 }
   0x7   :  { %1070 = shalt.err (!%p1067_p2)
}
   0x8   :  { %s1071_s18 = scalar_lea.vmem %s32_s10, 8192  ;;  %p1076_p4 = scmp.lt.s32.totalorder %s32_s10, %s32_s10 }
   0x9   :  { %p1072_p3 = scmp.ne.s32.totalorder %s32_s10, %s1071_s18  ;;  %p1077_p5 = scmp.lt.s32.totalorder %s1071_s18, %s1071_s18 }
   0xb   :  { %p1078_p6 = por %p1077_p5, %p1076_p4 }
   0xd   :  { %p1079_p7 = pnand %p1078_p6, %p1072_p3 }
   0xf   :  { %1082 = shalt.err (!%p1079_p7)
}
  0x10   :  { %s1110_s19 = smov 128   ;;  %s1111_s20 = smov 8  }
  0x11   :  { %37 = dma.hbm_to_vmem [thread:$0]  %s1253_s5, 8192, %s32_s10, [#allocation3], %s1110_s19, %s1110_s19, %s1111_s20  }
  0x12   :  { %s1112_s23 = smov [#allocation4]   ;;  %s1083_s27 = scalar_lea.hbm %s1254_s6, 64 }
  0x13   :  { %s43_s24 = sshll.u32 %s1112_s23, 4  ;;  %p1084_p8 = scmp.ne.s32.totalorder %s1254_s6, %s1083_s27  ;;  %s44_s24 = int_to_ptr.vmem [resolvable:$true] %s43_s24 }
  0x14   :  { %p1087_p9 = scmp.lt.u32.totalorder %s1083_s27, %s1254_s6 }
  0x16   :  { %p1089_p10 = pnand %p1087_p9, %p1084_p8 }
  0x18   :  { %1092 = shalt.err (!%p1089_p10)
}
  0x19   :  { %s1093_s12 = scalar_lea.vmem %s44_s24, 64  ;;  %p1098_p12 = scmp.lt.s32.totalorder %s44_s24, %s44_s24 }
  0x1a   :  { %p1094_p11 = scmp.ne.s32.totalorder %s44_s24, %s1093_s12  ;;  %p1099_p13 = scmp.lt.s32.totalorder %s1093_s12, %s1093_s12 }
  0x1c   :  { %p1100_p0 = por %p1099_p13, %p1098_p12 }
  0x1e   :  { %p1101_p1 = pnand %p1100_p0, %p1094_p11 }
  0x20   :  { %1104 = shalt.err (!%p1101_p1)
}
  0x21   :  { %s1113_s5 = smov 32   ;;  %s1114_s10 = smov 2  }
  0x22   :  { %49 = dma.hbm_to_vmem [thread:$0]  %s1254_s6, 64, %s44_s24, [#allocation5], %s1113_s5, %s1113_s5, %s1114_s10  }
  0x23   :  { %1105 = dma.done.wait [#allocation3], 8192  }
  0x24   :  { %1106 = vsyncadd [#allocation3], 4294959104 }
  0x25   :  { %1107 = dma.done.wait [#allocation5], 64  }
  0x26   :  { %1108 = vsyncadd [#allocation5], 4294967232  ;;  %v73_v0 = vlaneseq  ;;  %v1115_v1 = vmov 1983009808   ;;  %v1116_v3 = vmov 0   ;;  %v67_v7 = vld [vmem:[%s1251_s3] sm:$0xff] }
  0x27   :  { %v71_v2 = vunpack.c.l.s4 %v1115_v1  ;;  %135 = vmatprep.mubr.bf16.mxu0 %v1116_v3  ;;  %176 = vmatprep.mubr.bf16.mxu1 %v1116_v3  ;;  %vm90_vm0 = vcmask 1041408   ;;  %v69_v9 = vcombine.high %v67_v7, %v67_v7  ;;  %v961_v13 = vld [vmem:[%s1250_s2 + $0x4] ss:$16 sps:$4 sm:$0xff]   ;;  %v62_v14 = vld [vmem:[%s1249_s1] sm:$0xf]  ;;  %vm86_vm1 = vcmask 31744  }
  0x28   :  { %v1191_v4 = vshrl.u32 %v73_v0, 7  ;;  %v964_v17 = vld [vmem:[%s1250_s2 + $0xc] ss:$16 sps:$4 sm:$0xff]   ;;  %v959_v18 = vld [vmem:[%s1250_s2] ss:$16 sps:$4 sm:$0xff]   ;;  %vm205_vm2 = vcmask 130048  }
  0x29   :  { %v72_v5 = vunpack.c.0.s8 %v71_v2  ;;  %v967_v19 = vld [vmem:[#allocation2 + $0x4] ss:$8 sps:$4 sm:$0xff]   ;;  %v962_v20 = vld [vmem:[%s1250_s2 + $0x8] ss:$16 sps:$4 sm:$0xff]   ;;  %v61_v22 = vld [vmem:[%s1248_s0] sm:$0xf] }
  0x2a   :  { %v970_v21 = vld [vmem:[#allocation2 + $0x104] ss:$8 sps:$4 sm:$0xff]   ;;  %v965_v23 = vld [vmem:[#allocation2] ss:$8 sps:$4 sm:$0xff]   ;;  %v973_v24 = vld [vmem:[#allocation2 + $0x14] ss:$8 sps:$4 sm:$0xff]  }
  0x2b   :  { %v75_v6 = vsub.s32 %v72_v5, %v1191_v4  ;;  %v968_v25 = vld [vmem:[#allocation2 + $0x100] ss:$8 sps:$4 sm:$0xff]   ;;  %v976_v26 = vld [vmem:[#allocation2 + $0x114] ss:$8 sps:$4 sm:$0xff]   ;;  %v971_v27 = vld [vmem:[#allocation2 + $0x10] ss:$8 sps:$4 sm:$0xff]  }
  0x2c   :  { %v979_v28 = vld [vmem:[#allocation2 + $0x24] ss:$8 sps:$4 sm:$0xff]   ;;  %v974_v29 = vld [vmem:[#allocation2 + $0x110] ss:$8 sps:$4 sm:$0xff]   ;;  %v977_v31 = vld [vmem:[#allocation2 + $0x20] ss:$8 sps:$4 sm:$0xff]  }
  0x2d   :  { %v76_v8 = vrot.slane %v67_v7, %v75_v6  ;;  %v83_v12 = vrot.slane %v69_v9, %v75_v6  ;;  %v982_v30 = vld [vmem:[#allocation2 + $0x124] ss:$8 sps:$4 sm:$0xff]   ;;  %v985_v32 = vld [vmem:[#allocation2 + $0x34] ss:$8 sps:$4 sm:$0xff]   ;;  %v980_v33 = vld [vmem:[#allocation2 + $0x120] ss:$8 sps:$4 sm:$0xff]  }
  0x2e   :  { %v988_v34 = vld [vmem:[#allocation2 + $0x134] ss:$8 sps:$4 sm:$0xff]   ;;  %v983_v35 = vld [vmem:[#allocation2 + $0x30] ss:$8 sps:$4 sm:$0xff]   ;;  %v991_v36 = vld [vmem:[#allocation2 + $0x44] ss:$8 sps:$4 sm:$0xff]  }
  0x2f   :  { %v84_v10 = vcombine.high %v76_v8, %v76_v8  ;;  %v92_v11 = vsel %vm90_vm0, %v76_v8, 0  ;;  %v85_v15 = vcombine.high %v83_v12, %v83_v12  ;;  %v98_v16 = vsel %vm90_vm0, %v83_v12, 0  ;;  %v986_v37 = vld [vmem:[#allocation2 + $0x130] ss:$8 sps:$4 sm:$0xff]   ;;  %v994_v38 = vld [vmem:[#allocation2 + $0x144] ss:$8 sps:$4 sm:$0xff]  }
  0x30   :  { %v989_v39 = vld [vmem:[#allocation2 + $0x40] ss:$8 sps:$4 sm:$0xff]   ;;  %v997_v40 = vld [vmem:[#allocation2 + $0x54] ss:$8 sps:$4 sm:$0xff]   ;;  %v995_v42 = vld [vmem:[#allocation2 + $0x50] ss:$8 sps:$4 sm:$0xff]  }
  0x31   :  { %874 = vmatprep.subr.msk.bf16.mxu0 %vm90_vm0, %v84_v10  ;;  %876 = vmatprep.subr.msk.bf16.mxu1 %vm90_vm0, %v85_v15  ;;  %v992_v41 = vld [vmem:[#allocation2 + $0x140] ss:$8 sps:$4 sm:$0xff]   ;;  %v1000_v43 = vld [vmem:[#allocation2 + $0x154] ss:$8 sps:$4 sm:$0xff]   ;;  %v998_v44 = vld [vmem:[#allocation2 + $0x150] ss:$8 sps:$4 sm:$0xff]  }
  0x32   :  { %104 = vmatpush1.bf16.msra.mxu0 %v92_v11  ;;  %145 = vmatpush1.bf16.msra.mxu1 %v98_v16  ;;  %v1003_v45 = vld [vmem:[#allocation2 + $0x64] ss:$8 sps:$4 sm:$0xff]   ;;  %v1001_v47 = vld [vmem:[#allocation2 + $0x60] ss:$8 sps:$4 sm:$0xff]   ;;  %v1009_v48 = vld [vmem:[#allocation2 + $0x74] ss:$8 sps:$4 sm:$0xff]  }
  0x33   :  { %209 = vmatprep.subr.bf16.mxu0 %v961_v13  ;;  %250 = vmatprep.subr.bf16.mxu1 %v964_v17  ;;  %v1006_v46 = vld [vmem:[#allocation2 + $0x164] ss:$8 sps:$4 sm:$0xff]   ;;  %v1004_v49 = vld [vmem:[#allocation2 + $0x160] ss:$8 sps:$4 sm:$0xff]   ;;  %v1012_v50 = vld [vmem:[#allocation2 + $0x174] ss:$8 sps:$4 sm:$0xff]  }
  0x34   :  { %v1007_v51 = vld [vmem:[#allocation2 + $0x70] ss:$8 sps:$4 sm:$0xff]   ;;  %v1015_v52 = vld [vmem:[#allocation2 + $0x84] ss:$8 sps:$4 sm:$0xff]   ;;  %v1013_v55 = vld [vmem:[#allocation2 + $0x80] ss:$8 sps:$4 sm:$0xff]  }
  0x35   :  { %875 = vmatmul.mubr.msk.bf16.vlgmr.msra.gmra.mrb[0].mxu0 %vm86_vm1, %v62_v14  ;;  %877 = vmatmul.mubr.msk.bf16.vlgmr.msra.gmra.mrb[0].mxu1 %vm86_vm1, %v62_v14  ;;  %v1010_v53 = vld [vmem:[#allocation2 + $0x170] ss:$8 sps:$4 sm:$0xff]   ;;  %v1018_v54 = vld [vmem:[#allocation2 + $0x184] ss:$8 sps:$4 sm:$0xff]   ;;  %v1021_v56 = vld [vmem:[#allocation2 + $0x94] ss:$8 sps:$4 sm:$0xff]  }
  0x36   :  { %210 = vmatpush1.bf16.msra.mxu0 %v959_v18  ;;  %241 = vmatprep.mubr.bf16.mxu0 %v1116_v3  ;;  %v1016_v57 = vld [vmem:[#allocation2 + $0x180] ss:$8 sps:$4 sm:$0xff]   ;;  %v1024_v58 = vld [vmem:[#allocation2 + $0x194] ss:$8 sps:$4 sm:$0xff]   ;;  %v1019_v59 = vld [vmem:[#allocation2 + $0x90] ss:$8 sps:$4 sm:$0xff]  }
  0x37   :  { %529 = vmatprep.subr.bf16.mxu0 %v967_v19  ;;  %251 = vmatpush1.bf16.msra.mxu1 %v962_v20  ;;  %v1027_v60 = vld [vmem:[#allocation2 + $0xa4] ss:$8 sps:$4 sm:$0xff]   ;;  %v1022_v61 = vld [vmem:[#allocation2 + $0x190] ss:$8 sps:$4 sm:$0xff]   ;;  %v1025_v63 = vld [vmem:[#allocation2 + $0xa0] ss:$8 sps:$4 sm:$0xff]  }
  0x38   :  { %282 = vmatprep.mubr.bf16.mxu1 %v1116_v3  ;;  %795 = vmatprep.subr.bf16.mxu1 %v970_v21  ;;  %v1030_v62 = vld [vmem:[#allocation2 + $0x1a4] ss:$8 sps:$4 sm:$0xff]   ;;  %v1033_v0 = vld [vmem:[#allocation2 + $0xb4] ss:$8 sps:$4 sm:$0xff]   ;;  %v1028_v1 = vld [vmem:[#allocation2 + $0x1a0] ss:$8 sps:$4 sm:$0xff]  }
  0x39   :  { %v1031_v2 = vld [vmem:[#allocation2 + $0xb0] ss:$8 sps:$4 sm:$0xff]   ;;  %v1036_v3 = vld [vmem:[#allocation2 + $0x1b4] ss:$8 sps:$4 sm:$0xff]   ;;  %v1039_v6 = vld [vmem:[#allocation2 + $0xc4] ss:$8 sps:$4 sm:$0xff]  }
  0x3a   :  { %v1034_v5 = vld [vmem:[#allocation2 + $0x1b0] ss:$8 sps:$4 sm:$0xff]   ;;  %v1037_v7 = vld [vmem:[#allocation2 + $0xc0] ss:$8 sps:$4 sm:$0xff]   ;;  %v1042_v8 = vld [vmem:[#allocation2 + $0x1c4] ss:$8 sps:$4 sm:$0xff]  }
  0x3b   :  { %v1040_v9 = vld [vmem:[#allocation2 + $0x1c0] ss:$8 sps:$4 sm:$0xff]   ;;  %v1043_v10 = vld [vmem:[#allocation2 + $0xd0] ss:$8 sps:$4 sm:$0xff]   ;;  %v1045_v11 = vld [vmem:[#allocation2 + $0xd4] ss:$8 sps:$4 sm:$0xff]  }
  0x3c   :  { %v1048_v12 = vld [vmem:[#allocation2 + $0x1d4] ss:$8 sps:$4 sm:$0xff]   ;;  %v1046_v13 = vld [vmem:[#allocation2 + $0x1d0] ss:$8 sps:$4 sm:$0xff]   ;;  %v1051_v14 = vld [vmem:[#allocation2 + $0xe4] ss:$8 sps:$4 sm:$0xff]  }
  0x3d   :  { %882 = vmatmul.mubr.msk.bf16.vlgmr.msra.gmra.mrb[4].mxu0 %vm205_vm2, %v61_v22  ;;  %883 = vmatmul.mubr.msk.bf16.vlgmr.msra.gmra.mrb[4].mxu1 %vm205_vm2, %v61_v22  ;;  %v1049_v15 = vld [vmem:[#allocation2 + $0xe0] ss:$8 sps:$4 sm:$0xff]   ;;  %v1054_v16 = vld [vmem:[#allocation2 + $0x1e4] ss:$8 sps:$4 sm:$0xff]   ;;  %v1057_v18 = vld [vmem:[#allocation2 + $0xf4] ss:$8 sps:$4 sm:$0xff]  }
  0x3e   :  { %530 = vmatpush1.bf16.msra.mxu0 %v965_v23  ;;  %796 = vmatpush1.bf16.msra.mxu1 %v968_v25  ;;  %v1052_v17 = vld [vmem:[#allocation2 + $0x1e0] ss:$8 sps:$4 sm:$0xff]   ;;  %v1055_v19 = vld [vmem:[#allocation2 + $0xf0] ss:$8 sps:$4 sm:$0xff]   ;;  %v1060_v20 = vld [vmem:[#allocation2 + $0x1f4] ss:$8 sps:$4 sm:$0xff]  }
  0x3f   :  { %531 = vmatprep.subr.bf16.mxu0 %v973_v24  ;;  %797 = vmatprep.subr.bf16.mxu1 %v976_v26  ;;  %v1058_v21 = vld [vmem:[#allocation2 + $0x1f0] ss:$8 sps:$4 sm:$0xff]   ;;  %vm856_vm3 = vcmask 7168   ;;  %vm866_vm4 = vcmask 15360  }
  0x42   :  { %532 = vmatpush1.bf16.msra.mxu0 %v971_v27  ;;  %798 = vmatpush1.bf16.msra.mxu1 %v974_v29 }
  0x43   :  { %533 = vmatprep.subr.bf16.mxu0 %v979_v28  ;;  %799 = vmatprep.subr.bf16.mxu1 %v982_v30  ;;  %v1216_v28 = vsub.s32 0, %v1191_v4  ;;  %v291_v30 = vld [vmem:[%s1252_s4] sm:$0xf] }
  0x46   :  { %534 = vmatpush1.bf16.msra.mxu0 %v977_v31  ;;  %800 = vmatpush1.bf16.msra.mxu1 %v980_v33  ;;  %v1222_v31 = vsub.s32 1, %v1191_v4  ;;  %v303_v33 = vsub.s32 2, %v1191_v4 }
  0x47   :  { %535 = vmatprep.subr.bf16.mxu0 %v985_v32  ;;  %801 = vmatprep.subr.bf16.mxu1 %v988_v34  ;;  %v307_v34 = vsub.s32 3, %v1191_v4 }
  0x4a   :  { %536 = vmatpush1.bf16.msra.mxu0 %v983_v35  ;;  %802 = vmatpush1.bf16.msra.mxu1 %v986_v37  ;;  %v296_v35 = vrot.slane %v291_v30, %v1216_v28  ;;  %v300_v37 = vrot.slane %v291_v30, %v1222_v31 }
  0x4b   :  { %537 = vmatprep.subr.bf16.mxu0 %v991_v36  ;;  %803 = vmatprep.subr.bf16.mxu1 %v994_v38 }
  0x4e   :  { %538 = vmatpush1.bf16.msra.mxu0 %v989_v39  ;;  %804 = vmatpush1.bf16.msra.mxu1 %v992_v41 }
  0x4f   :  { %539 = vmatprep.subr.bf16.mxu0 %v997_v40  ;;  %805 = vmatprep.subr.bf16.mxu1 %v1000_v43  ;;  %v304_v40 = vrot.slane %v291_v30, %v303_v33 }
  0x52   :  { %540 = vmatpush1.bf16.msra.mxu0 %v995_v42  ;;  %806 = vmatpush1.bf16.msra.mxu1 %v998_v44  ;;  %v308_v44 = vrot.slane %v291_v30, %v307_v34 }
  0x53   :  { %541 = vmatprep.subr.bf16.mxu0 %v1003_v45  ;;  %807 = vmatprep.subr.bf16.mxu1 %v1006_v46 }
  0x56   :  { %542 = vmatpush1.bf16.msra.mxu0 %v1001_v47  ;;  %808 = vmatpush1.bf16.msra.mxu1 %v1004_v49 }
  0x57   :  { %543 = vmatprep.subr.bf16.mxu0 %v1009_v48  ;;  %809 = vmatprep.subr.bf16.mxu1 %v1012_v50 }
  0x5a   :  { %544 = vmatpush1.bf16.msra.mxu0 %v1007_v51  ;;  %810 = vmatpush1.bf16.msra.mxu1 %v1010_v53 }
  0x5b   :  { %545 = vmatprep.subr.bf16.mxu0 %v1015_v52  ;;  %811 = vmatprep.subr.bf16.mxu1 %v1018_v54 }
  0x5e   :  { %546 = vmatpush1.bf16.msra.mxu0 %v1013_v55  ;;  %812 = vmatpush1.bf16.msra.mxu1 %v1016_v57 }
  0x5f   :  { %547 = vmatprep.subr.bf16.mxu0 %v1021_v56  ;;  %813 = vmatprep.subr.bf16.mxu1 %v1024_v58 }
  0x62   :  { %548 = vmatpush1.bf16.msra.mxu0 %v1019_v59  ;;  %814 = vmatpush1.bf16.msra.mxu1 %v1022_v61 }
  0x63   :  { %549 = vmatprep.subr.bf16.mxu0 %v1027_v60  ;;  %815 = vmatprep.subr.bf16.mxu1 %v1030_v62  ;;  %v357_v62 = vld [vmem:[#allocation4] sm:$0x3] }
  0x66   :  { %550 = vmatpush1.bf16.msra.mxu0 %v1025_v63  ;;  %816 = vmatpush1.bf16.msra.mxu1 %v1028_v1  ;;  %v623_v63 = vld [vmem:[#allocation4 + $0x2] sm:$0x3]  ;;  %v366_v1 = vrot.slane %v357_v62, %v1222_v31 }
  0x67   :  { %551 = vmatprep.subr.bf16.mxu0 %v1033_v0  ;;  %817 = vmatprep.subr.bf16.mxu1 %v1036_v3  ;;  %v362_v0 = vrot.slane %v357_v62, %v1216_v28  ;;  %v628_v3 = vrot.slane %v623_v63, %v1216_v28 }
  0x6a   :  { %552 = vmatpush1.bf16.msra.mxu0 %v1031_v2  ;;  %818 = vmatpush1.bf16.msra.mxu1 %v1034_v5  ;;  %v572_v2 = vld [vmem:[%s1255_s7] sm:$0x3] }
  0x6b   :  { %553 = vmatprep.subr.bf16.mxu0 %v1039_v6  ;;  %819 = vmatprep.subr.bf16.mxu1 %v1042_v8  ;;  %v948_v6 = vld [vmem:[%s1255_s7 + $0x2] sm:$0x3] }
  0x6e   :  { %554 = vmatpush1.bf16.msra.mxu0 %v1037_v7  ;;  %820 = vmatpush1.bf16.msra.mxu1 %v1040_v9  ;;  %v632_v7 = vrot.slane %v623_v63, %v1222_v31 }
  0x6f   :  { %555 = vmatprep.subr.bf16.mxu0 %v1045_v11  ;;  %821 = vmatprep.subr.bf16.mxu1 %v1048_v12 }
  0x72   :  { %556 = vmatpush1.bf16.msra.mxu0 %v1043_v10  ;;  %822 = vmatpush1.bf16.msra.mxu1 %v1046_v13  ;;  %v577_v10 = vrot.slane %v572_v2, %v1216_v28 }
  0x73   :  { %557 = vmatprep.subr.bf16.mxu0 %v1051_v14  ;;  %823 = vmatprep.subr.bf16.mxu1 %v1054_v16  ;;  %v581_v14 = vrot.slane %v572_v2, %v1222_v31 }
  0x76   :  { %558 = vmatpush1.bf16.msra.mxu0 %v1049_v15  ;;  %824 = vmatpush1.bf16.msra.mxu1 %v1052_v17  ;;  %v844_v17 = vrot.slane %v948_v6, %v1216_v28  ;;  %v949_v28 = vld [vmem:[%s1256_s8] ss:$0 sm:$0xff] }
  0x77   :  { %559 = vmatprep.subr.bf16.mxu0 %v1057_v18  ;;  %825 = vmatprep.subr.bf16.mxu1 %v1060_v20 }
  0x7a   :  { %560 = vmatpush1.bf16.msra.mxu0 %v1055_v19  ;;  %826 = vmatpush1.bf16.msra.mxu1 %v1058_v21 }
 0x108   :  { %v137_v22 = vpop.f32.mrb[0].mxu0  ;;  %v178_v25 = vpop.f32.mrb[0].mxu1 }
 0x109   :  { %v139_v23 = vpop.f32.mrb[1].mxu0  ;;  %v180_v27 = vpop.f32.mrb[1].mxu1 }
 0x10a   :  { %v141_v24 = vpop.f32.mrb[2].mxu0  ;;  %v182_v29 = vpop.f32.mrb[2].mxu1 }
 0x10b   :  { %v142_v26 = vpop.f32.mrb[3].mxu0  ;;  %v183_v32 = vpop.f32.mrb[3].mxu1 }
 0x110   :  { %v243_v36 = vpop.f32.mrb[4].mxu0  ;;  %v284_v43 = vpop.f32.mrb[4].mxu1 }
 0x111   :  { %v244_v38 = vadd.f32 %v243_v36, %v137_v22  ;;  %v245_v39 = vpop.f32.mrb[5].mxu0  ;;  %v285_v46 = vadd.f32 %v284_v43, %v178_v25  ;;  %v286_v48 = vpop.f32.mrb[5].mxu1  ;;  %v848_v22 = vrot.slane %v948_v6, %v1222_v31 }
 0x112   :  { %v246_v41 = vadd.f32 %v245_v39, %v139_v23  ;;  %v247_v42 = vpop.f32.mrb[6].mxu0  ;;  %v287_v50 = vadd.f32 %v286_v48, %v180_v27  ;;  %v288_v51 = vpop.f32.mrb[6].mxu1 }
 0x113   :  { %v313_v45 = vadd.f32 %v296_v35, %v244_v38  ;;  %v248_v47 = vpop.f32.mrb[7].mxu0  ;;  %v315_v52 = vadd.f32 %v304_v40, %v285_v46  ;;  %v289_v53 = vpop.f32.mrb[7].mxu1 }
 0x114   :  { %v314_v49 = vadd.f32 %v300_v37, %v246_v41  ;;  %v316_v55 = vadd.f32 %v308_v44, %v287_v50 }
 0x115   :  { %v317_v4 = vmax.f32 %v313_v45, 0.0  ;;  %v319_v56 = vmax.f32 %v315_v52, 0.0 }
 0x116   :  { %v318_v54 = vmax.f32 %v314_v49, 0.0  ;;  %v320_v58 = vmax.f32 %v316_v55, 0.0 }
 0x117   :  { %v321_v59 = vpack.c.bf16 %v317_v4, %v317_v4  ;;  %v323_v61 = vpack.c.bf16 %v319_v56, %v319_v56 }
 0x118   :  { %v322_v57 = vpack.c.bf16 %v318_v54, %v318_v54  ;;  %v324_v60 = vpack.c.bf16 %v320_v58, %v320_v58 }
 0x11a   :  { %561 = vmatprep.mubr.bf16.mxu0 %v322_v57  ;;  %827 = vmatprep.mubr.bf16.mxu1 %v324_v60 }
 0x11b   :  { %562 = vmatmul.mubr.bf16.vlgmr.msra.gmra.mrb[8].mxu0 %v321_v59  ;;  %828 = vmatmul.mubr.bf16.vlgmr.msra.gmra.mrb[8].mxu1 %v323_v61 }
 0x1ee   :  { %v563_v5 = vpop.f32.mrb[8].mxu0  ;;  %v829_v13 = vpop.f32.mrb[8].mxu1 }
 0x1ef   :  { %v564_v8 = vadd.f32 %v563_v5, %v362_v0  ;;  %v565_v9 = vpop.f32.mrb[9].mxu0  ;;  %v830_v16 = vadd.f32 %v829_v13, %v628_v3  ;;  %v831_v19 = vpop.f32.mrb[9].mxu1 }
 0x1f0   :  { %v566_v11 = vadd.f32 %v565_v9, %v366_v1  ;;  %v567_v12 = vpop.f32.mrb[10].mxu0  ;;  %v832_v21 = vadd.f32 %v831_v19, %v632_v7  ;;  %v833_v23 = vpop.f32.mrb[10].mxu1 }
 0x1f1   :  { %v570_v15 = vmax.f32 %v564_v8, 0.0  ;;  %v568_v18 = vpop.f32.mrb[11].mxu0  ;;  %v836_v24 = vmax.f32 %v830_v16, 0.0  ;;  %v834_v25 = vpop.f32.mrb[11].mxu1 }
 0x1f2   :  { %v571_v20 = vmax.f32 %v566_v11, 0.0  ;;  %v837_v27 = vmax.f32 %v832_v21, 0.0 }
 0x1f3   :  { %v584_v26 = vmul.f32 %v577_v10, %v570_v15  ;;  %v851_v30 = vmul.f32 %v844_v17, %v836_v24 }
 0x1f4   :  { %v585_v29 = vmul.f32 %v581_v14, %v571_v20  ;;  %v852_v32 = vmul.f32 %v848_v22, %v837_v27 }
 0x1f6   :  { %v586_v33 = vadd.f32 %v585_v29, %v584_v26  ;;  %v853_v34 = vadd.f32 %v852_v32, %v851_v30 }
 0x1f8   :  { %587 = vadd.xlane.f32.xlu0 %v586_v33 }
 0x1fc   :  { %854 = vadd.xlane.f32.xlu0 %v853_v34 }
 0x285   :  { %v588_v35 = vpop.xlane.xlu0 %587 }
 0x289   :  { %v855_v36 = vpop.xlane.xlu0 %854 }
 0x28a   :  { %v857_v31 = vsel %vm856_vm3, %v588_v35, %v855_v36 }
 0x28b   :  { %v865_v37 = vadd.f32 %v949_v28, %v857_v31 }
 0x28d   :  { %867 = vst.msk [vmem:[%s1257_s9] sm:$0xff] %vm866_vm4, %v865_v37 }
 0x28e   :  { %872 = vsyncpa [#allocation3], 1 }
 0x28f   :  { %873 = vsyncpa [#allocation5], 1 }

</bundles_post_ra>
